<compile_context>
chip_gen: v7x
topology: tpu7x:2x2x1
jax: 0.10.0
libtpu: 0.0.40
codegen_flags: <defaults>
</compile_context>

<pallas_src>
import functools

import jax
import jax.numpy as jnp
from jax import lax
from jax.experimental import pallas as pl
from jax.experimental.pallas import tpu as pltpu


def _round_up(x, m):
    return ((x + m - 1) // m) * m


# ----------------------------------------------------------------------------
# Pallas kernel: per-(batch, N-block) cost matrix + pairwise IoU, N lane-dense
# ----------------------------------------------------------------------------
def _cost_kernel(
    l1_ref,        # [1, TN, C]     head-1 logits, bf16
    l2_ref,        # [1, TN, C]     head-2 logits, bf16
    l3_ref,        # [1, TN, C]     head-3 logits, bf16
    boxes_ref,     # [1, 8, TN]     rows 0..3 abs xyxy, rows 4..7 normalized xyxy (f32)
    tgt_ref,       # [1, Gp, 8]     cols 0..3 abs xyxy, cols 4..7 normalized xyxy (f32)
    onehot_ref,    # [1, H*Gp, C]   per-head one-hot class rows, bf16
    cost_ref,      # [1, Gp, TN]    output (f32)
    ious_ref,      # [1, Gp, TN]    output (f32)
    *, alpha, gamma, w_bbox, w_giou, num_heads,
):
    G = tgt_ref.shape[1]

    boxes = boxes_ref[0]                     # [8, TN]
    tgt = tgt_ref[0]                         # [Gp, 8]

    # ---- pred box coordinates (abs / normalized): [1, TN] lane rows ----
    px0, py0, px1, py1 = boxes[0:1], boxes[1:2], boxes[2:3], boxes[3:4]
    pn0, pn1, pn2, pn3 = boxes[4:5], boxes[5:6], boxes[6:7], boxes[7:8]
    # ---- gt box coordinates (abs / normalized): [Gp, 1] sublane columns ----
    tx0, ty0, tx1, ty1 = tgt[:, 0:1], tgt[:, 1:2], tgt[:, 2:3], tgt[:, 3:4]
    tn0, tn1, tn2, tn3 = tgt[:, 4:5], tgt[:, 5:6], tgt[:, 6:7], tgt[:, 7:8]

    # ---------------- get_in_boxes_info ----------------
    acx = (px0 + px1) * 0.5                  # anchor centers [1, TN]
    acy = (py0 + py1) * 0.5
    gcx = (tx0 + tx1) * 0.5                  # gt centers     [Gp, 1]
    gcy = (ty0 + ty1) * 0.5
    gw = tx1 - tx0
    gh = ty1 - ty0

    in_box = (acx > tx0) & (acx < tx1) & (acy > ty0) & (acy < ty1)        # [Gp, TN]
    in_box_all = jnp.max(in_box.astype(jnp.float32), axis=0, keepdims=True) > 0.0

    r = 2.5
    in_ctr = ((acx > (gcx - r * gw)) & (acx < (gcx + r * gw)) &
              (acy > (gcy - r * gh)) & (acy < (gcy + r * gh)))            # [Gp, TN]
    in_ctr_all = jnp.max(in_ctr.astype(jnp.float32), axis=0, keepdims=True) > 0.0

    fg_mask = in_box_all | in_ctr_all                                     # [1, TN]
    in_box_and_ctr = in_box & in_ctr                                      # [Gp, TN]

    # ---------------- pairwise IoU / GIoU ----------------
    eps = 1e-9
    ix0 = jnp.maximum(px0, tx0)
    iy0 = jnp.maximum(py0, ty0)
    ix1 = jnp.minimum(px1, tx1)
    iy1 = jnp.minimum(py1, ty1)
    inter = jnp.maximum(ix1 - ix0, 0.0) * jnp.maximum(iy1 - iy0, 0.0)     # [Gp, TN]

    area_p = (px1 - px0) * (py1 - py0)                                    # [1, TN]
    area_t = (tx1 - tx0) * (ty1 - ty0)                                    # [Gp, 1]
    union = area_p + area_t - inter
    iou = inter * pl.reciprocal(union + eps, approx=True)                 # [Gp, TN]

    ex0 = jnp.minimum(px0, tx0)
    ey0 = jnp.minimum(py0, ty0)
    ex1 = jnp.maximum(px1, tx1)
    ey1 = jnp.maximum(py1, ty1)
    area_e = (ex1 - ex0) * (ey1 - ey0)
    giou = iou - (area_e - union) * pl.reciprocal(area_e + eps, approx=True)

    # ---------------- L1 (cdist p=1) on host-normalized boxes ----------------
    cost_l1 = (jnp.abs(pn0 - tn0) + jnp.abs(pn1 - tn1) +
               jnp.abs(pn2 - tn2) + jnp.abs(pn3 - tn3))                   # [Gp, TN]

    # ---------------- focal classification cost: gather FIRST, focal SECOND --
    # onehot[Gp,C] x logits[TN,C]^T extracts the logit of each GT's class for
    # every query (exact — one-hot is 0/1, f32 MXU accumulate); the focal
    # transcendentals then run only on [Gp, TN] instead of [3C, TN].
    onehot_all = onehot_ref[0]                                            # [H*Gp, C] bf16
    heads = (l1_ref, l2_ref, l3_ref)[:num_heads]
    leps = 1e-8
    cls_sum = None
    for h in range(num_heads):
        logits_h = heads[h][0]                                            # [TN, C] bf16
        oh = onehot_all[h * G:(h + 1) * G, :]                             # [Gp, C] bf16
        g_logit = lax.dot_general(                                        # [Gp, TN] f32
            oh, logits_h,
            dimension_numbers=(((1,), (1,)), ((), ())),
            preferred_element_type=jnp.float32)
        p = jax.nn.sigmoid(g_logit)
        if gamma == 2.0:                      # strength-reduce pow -> multiply
            pw = p * p
            opw = (1.0 - p) * (1.0 - p)
        else:
            pw = p ** gamma
            opw = (1.0 - p) ** gamma
        neg = (1.0 - alpha) * pw * (-jnp.log(1.0 - p + leps))
        pos = alpha * opw * (-jnp.log(p + leps))
        term = pos - neg
        cls_sum = term if cls_sum is None else cls_sum + term
    # reference: self.cost_class = 1 / num_heads, then sum over heads == mean
    cost_cls = cls_sum * (1.0 / float(num_heads))                         # [Gp, TN]

    # ---------------- assemble cost ----------------
    not_ibc = 1.0 - in_box_and_ctr.astype(jnp.float32)                    # [Gp, TN]
    not_fg = 1.0 - fg_mask.astype(jnp.float32)                            # [1, TN]
    cost = (w_bbox * cost_l1 + cost_cls + w_giou * (-giou)
            + 100.0 * not_ibc + 10000.0 * not_fg)

    cost_ref[0] = cost
    ious_ref[0] = iou


def compute_cost_and_ious(outputs, targets, *, alpha=0.25, gamma=2.0,
                          cost_bbox=1.0, cost_giou=1.0, max_lane_block=512):
    """Runs the Pallas kernel over the batch. Returns cost [bs,G,N], ious [bs,G,N] (f32)."""
    heads = [outputs["pred_logits_1"], outputs["pred_logits_2"],
             outputs["pred_logits_3"]]
    num_heads = len(heads)
    bs, N, C = heads[0].shape

    boxes = outputs["pred_boxes"].astype(jnp.float32)                     # [bs, N, 4]
    tgt = targets["boxes_xyxy"].astype(jnp.float32)                       # [bs, G, 4]
    G = tgt.shape[1]
    img = targets["image_size_xyxy"].astype(jnp.float32).reshape(bs, 1, 4)
    # targets["image_size_xyxy_tgt"] is image_size tiled over G -> not needed.

    # ---- pad N to x128 (lane-dense stores) and G to x8 (full sublane tiles) ----
    N_pad = max(_round_up(N, 128), 128)
    G_pad = max(_round_up(G, 8), 8)

    def pad_axis(x, axis, new):
        if x.shape[axis] == new:
            return x
        pad = [(0, 0)] * x.ndim
        pad[axis] = (0, new - x.shape[axis])
        return jnp.pad(x, pad)   # zero padding: dummy GTs never hit in_box/in_ctr/IoU

    heads_p = [pad_axis(h.astype(jnp.bfloat16), 1, N_pad) for h in heads]  # bf16 DMA
    boxes_p = pad_axis(boxes, 1, N_pad)                                    # [bs, Np, 4]
    tgt_p = pad_axis(tgt, 1, G_pad)                                        # [bs, Gp, 4]

    # abs + normalized boxes stacked; N on lanes for predictions (tiny host transpose).
    boxes8 = jnp.concatenate([boxes_p, boxes_p / img], axis=-1)            # [bs, Np, 8]
    boxes8_t = jnp.transpose(boxes8, (0, 2, 1))                            # [bs, 8, Np]
    tgt8 = jnp.concatenate([tgt_p, tgt_p / img], axis=-1)                  # [bs, Gp, 8]

    labels = jnp.stack([targets["labels_1"], targets["labels_2"],
                        targets["labels_3"]], axis=1).astype(jnp.int32)    # [bs, H, G]
    labels_p = pad_axis(labels, 2, G_pad)                                  # dummy GT -> class 0
    onehot = jax.nn.one_hot(labels_p, C, dtype=jnp.bfloat16)               # [bs, H, Gp, C]
    onehot = onehot.reshape(bs, num_heads * G_pad, C)

    # ---- second (parallel) grid axis tiling N: feeds v7x's 2nd TensorCore ----
    if N_pad <= max_lane_block:
        TN = N_pad
    else:
        TN = 128
        for cand in (512, 384, 256, 128):
            if N_pad % cand == 0:
                TN = cand
                break
    n_blk = N_pad // TN

    kernel = functools.partial(
        _cost_kernel, alpha=alpha, gamma=gamma,
        w_bbox=cost_bbox, w_giou=cost_giou, num_heads=num_heads)

    logits_spec = pl.BlockSpec((1, TN, C), lambda b, j: (b, j, 0))
    grid_spec = pltpu.PrefetchScalarGridSpec(
        num_scalar_prefetch=0,
        grid=(bs, n_blk),
        in_specs=[
            logits_spec,                                                   # head 1
            logits_spec,                                                   # head 2
            logits_spec,                                                   # head 3
            pl.BlockSpec((1, 8, TN), lambda b, j: (b, 0, j)),              # pred boxes
            pl.BlockSpec((1, G_pad, 8), lambda b, j: (b, 0, 0)),           # gt boxes
            pl.BlockSpec((1, num_heads * G_pad, C), lambda b, j: (b, 0, 0)),  # one-hot
        ],
        out_specs=[
            pl.BlockSpec((1, G_pad, TN), lambda b, j: (b, 0, j)),
            pl.BlockSpec((1, G_pad, TN), lambda b, j: (b, 0, j)),
        ],
    )

    cost, ious = pl.pallas_call(
        kernel,
        out_shape=(jax.ShapeDtypeStruct((bs, G_pad, N_pad), jnp.float32),
                   jax.ShapeDtypeStruct((bs, G_pad, N_pad), jnp.float32)),
        grid_spec=grid_spec,
        compiler_params=pltpu.CompilerParams(
            dimension_semantics=("parallel", "parallel")),
    )(*heads_p, boxes8_t, tgt8, onehot)

    # padded GT rows / padded queries are sliced away before simOTA bookkeeping.
    return cost[:, :G, :N], ious[:, :G, :N]


# ----------------------------------------------------------------------------
# dynamic_k_matching — data-dependent simOTA assignment (plain JAX, vmapped)
# cost / ious come in as [G, N] (GT-major), matching the kernel output layout.
# ----------------------------------------------------------------------------
# TODO(synk): the variable-length outputs (gt_indices for selected queries only)
# are returned as a full-length per-query argmax + boolean selection mask, since
# dynamic shapes cannot be expressed in JAX/Pallas.
def _dynamic_k_matching_single(cost, ious, *, ota_k):
    G, N = cost.shape
    cost = cost.astype(jnp.float32)

    # dynamic k per GT — over ALL queries, exactly as in this module's reference.
    topk_ious, _ = lax.top_k(ious, ota_k)                          # [G, k]
    dynamic_ks = jnp.clip(topk_ious.sum(-1).astype(jnp.int32), 1, ota_k)   # [G]

    # initial 1-to-k matching: dynamic_ks[g] smallest costs per GT.
    # dynamic_ks <= ota_k (sum of <= ota_k IoUs <= 1), so top_k(k=ota_k) suffices
    # and replaces the two full argsorts over N.
    _, topk_idx = lax.top_k(-cost, ota_k)                          # [G, k] ascending cost
    keep = jnp.arange(ota_k)[None, :] < dynamic_ks[:, None]        # [G, k]
    n_iota3 = jnp.arange(N)[None, None, :]
    matching = jnp.any((topk_idx[:, :, None] == n_iota3) & keep[:, :, None],
                       axis=1).astype(jnp.float32)                 # [G, N]

    g_iota = jnp.arange(G)[:, None]                                # [G, 1]
    n_iota = jnp.arange(N)[None, :]                                # [1, N]

    # pre-loop conflict resolution (queries matched to >1 GT)
    anchor_matching_gt = matching.sum(0)                           # [N]
    stale_multi = anchor_matching_gt > 1.0                         # [N]
    argmin_g0 = jnp.argmin(cost, axis=0)                           # [N]
    matching = jnp.where(stale_multi[None, :], 0.0, matching)
    matching = jnp.where(stale_multi[None, :] & (g_iota == argmin_g0[None, :]),
                         1.0, matching)

    def cond_fn(state):
        _, m = state
        return jnp.any(m.sum(1) == 0.0)

    def body_fn(state):
        c, m = state
        # Per-element guard so jax.vmap of this while_loop stays exact for
        # batch elements that have already converged.
        active = jnp.any(m.sum(1) == 0.0)

        matched_q = m.sum(0) > 0.0                                 # [N]
        c_new = c + jnp.where(matched_q[None, :], 100000.0, 0.0)
        unmatched_gt = m.sum(1) == 0.0                             # [G]
        pos = jnp.argmin(c_new, axis=1)                            # [G]
        m_new = jnp.where(unmatched_gt[:, None] & (n_iota == pos[:, None]), 1.0, m)

        # Faithful to the PyTorch reference: the trigger is the CURRENT multi-match
        # condition, but the rows rewritten (and re-assigned to the argmin of the
        # CURRENT cost) are selected by the STALE pre-loop `anchor_matching_gt > 1`
        # mask — the reference never recomputes anchor_matching_gt inside its loop.
        any_multi_now = jnp.any(m_new.sum(0) > 1.0)
        argmin_g_now = jnp.argmin(c_new, axis=0)                   # [N]

        def resolve(mm):
            mm = jnp.where(stale_multi[None, :], 0.0, mm)
            mm = jnp.where(stale_multi[None, :] & (g_iota == argmin_g_now[None, :]),
                           1.0, mm)
            return mm

        m_new = lax.cond(any_multi_now, resolve, lambda mm: mm, m_new)
        c = jnp.where(active, c_new, c)
        m = jnp.where(active, m_new, m)
        return (c, m)

    cost, matching = lax.while_loop(cond_fn, body_fn, (cost, matching))

    selected_query = matching.sum(0) > 0.0                         # [N] bool
    gt_indices = jnp.argmax(matching, axis=0)                      # [N]
    cost_masked = cost + jnp.where(matching == 0.0, jnp.inf, 0.0)
    matched_query_id = jnp.argmin(cost_masked, axis=1)             # [G]
    return (selected_query, gt_indices), matched_query_id


@functools.partial(jax.jit, static_argnames=("ota_k",))
def dynamic_k_matching_batch(cost_gn, ious_gn, ota_k):
    fn = functools.partial(_dynamic_k_matching_single, ota_k=ota_k)
    return jax.vmap(fn)(cost_gn, ious_gn)


# ----------------------------------------------------------------------------
# Module-equivalent wrapper
# ----------------------------------------------------------------------------
class HungarianMatcherDynamicKPallas:
    def __init__(self, cost_class=1.0, cost_bbox=1.0, cost_giou=1.0,
                 use_focal=True, ota_k=5, focal_loss_alpha=0.25,
                 focal_loss_gamma=2.0):
        assert use_focal, "only the focal-loss branch is implemented"
        self.cost_bbox = cost_bbox
        self.cost_giou = cost_giou
        self.ota_k = ota_k
        self.alpha = focal_loss_alpha
        self.gamma = focal_loss_gamma

    def __call__(self, outputs, targets):
        bs, N = outputs["pred_logits_1"].shape[:2]
        G = targets["boxes_xyxy"].shape[1]
        if G == 0:   # reference's num_insts == 0 early-exit (no GT boxes)
            sel = jnp.zeros((N,), bool)
            empty = jnp.zeros((0,), jnp.int32)
            return ([(sel, empty) for _ in range(bs)],
                    [empty for _ in range(bs)])
        cost, ious = compute_cost_and_ious(
            outputs, targets, alpha=self.alpha, gamma=self.gamma,
            cost_bbox=self.cost_bbox, cost_giou=self.cost_giou)
        (sel, gt_idx), mq = dynamic_k_matching_batch(cost, ious, self.ota_k)
        indices = [(sel[b], gt_idx[b]) for b in range(bs)]
        matched_ids = [mq[b] for b in range(bs)]
        return indices, matched_ids


# ----------------------------------------------------------------------------
# Example run
# ----------------------------------------------------------------------------
def _make_boxes(key, n, img_w, img_h):
    k1, k2, k3, k4 = jax.random.split(key, 4)
    cx = jax.random.uniform(k1, (n,), minval=8.0, maxval=img_w - 8.0)
    cy = jax.random.uniform(k2, (n,), minval=8.0, maxval=img_h - 8.0)
    w = jax.random.uniform(k3, (n,), minval=4.0, maxval=16.0)
    h = jax.random.uniform(k4, (n,), minval=4.0, maxval=16.0)
    return jnp.stack([cx - w / 2, cy - h / 2, cx + w / 2, cy + h / 2], axis=-1)


if __name__ == "__main__":
    key = jax.random.PRNGKey(0)
    bs, N, C, G = 2, 128, 8, 5          # N already x128; G is padded to 8 internally
    img_w = img_h = 64.0

    ks = jax.random.split(key, 12)
    outputs = {
        "pred_logits_1": jax.random.normal(ks[0], (bs, N, C), jnp.float32),
        "pred_logits_2": jax.random.normal(ks[1], (bs, N, C), jnp.float32),
        "pred_logits_3": jax.random.normal(ks[2], (bs, N, C), jnp.float32),
        "pred_boxes": jnp.stack(
            [_make_boxes(ks[3 + b], N, img_w, img_h) for b in range(bs)], axis=0),
    }

    gt_boxes = jnp.stack(
        [_make_boxes(ks[5 + b], G, img_w, img_h) for b in range(bs)], axis=0)
    img_size = jnp.tile(jnp.array([img_w, img_h, img_w, img_h], jnp.float32),
                        (bs, 1))
    targets = {
        "labels_1": jax.random.randint(ks[7], (bs, G), 0, C),
        "labels_2": jax.random.randint(ks[8], (bs, G), 0, C),
        "labels_3": jax.random.randint(ks[9], (bs, G), 0, C),
        "boxes_xyxy": gt_boxes,
        "image_size_xyxy": img_size,
        # image_size_xyxy_tgt is image_size tiled over G; boxes are normalized
        # host-side so the kernel needs neither.
    }

    matcher = HungarianMatcherDynamicKPallas(ota_k=5)
    indices, matched_ids = matcher(outputs, targets)
    for (sel, gt_idx), mq in zip(indices, matched_ids):
        jax.block_until_ready(sel)
        jax.block_until_ready(gt_idx)
        jax.block_until_ready(mq)
    print("KERNEL_OK")
</pallas_src>

<mosaic_0001>
module attributes {stable_mosaic.version = 11 : i64} {
  func.func @_cost_kernel(%arg0: i32, %arg1: i32, %arg2: memref<1x128x8xbf16, #tpu.memory_space<vmem>>, %arg3: memref<1x128x8xbf16, #tpu.memory_space<vmem>>, %arg4: memref<1x128x8xbf16, #tpu.memory_space<vmem>>, %arg5: memref<1x8x128xf32, #tpu.memory_space<vmem>>, %arg6: memref<1x8x8xf32, #tpu.memory_space<vmem>>, %arg7: memref<1x24x8xbf16, #tpu.memory_space<vmem>>, %arg8: memref<1x8x128xf32, #tpu.memory_space<vmem>>, %arg9: memref<1x8x128xf32, #tpu.memory_space<vmem>>) attributes {dimension_semantics = [#tpu.dimension_semantics<parallel>, #tpu.dimension_semantics<parallel>], iteration_bounds = array<i64: 2, 1>, scalar_prefetch = 0 : i64, scratch_operands = 0 : i64, tpu.core_type = #tpu.core_type<tc>, window_params = [{transform_indices = @transform_0, window_bounds = array<i64: 1, 128, 8>}, {transform_indices = @transform_1, window_bounds = array<i64: 1, 128, 8>}, {transform_indices = @transform_2, window_bounds = array<i64: 1, 128, 8>}, {transform_indices = @transform_3, window_bounds = array<i64: 1, 8, 128>}, {transform_indices = @transform_4, window_bounds = array<i64: 1, 8, 8>}, {transform_indices = @transform_5, window_bounds = array<i64: 1, 24, 8>}, {transform_indices = @transform_6, window_bounds = array<i64: 1, 8, 128>}, {transform_indices = @transform_7, window_bounds = array<i64: 1, 8, 128>}]} {
    %c0 = arith.constant 0 : index
    %c0_0 = arith.constant 0 : index
    %c0_1 = arith.constant 0 : index
    %0 = vector.load %arg5[%c0, %c0_0, %c0_1] : memref<1x8x128xf32, #tpu.memory_space<vmem>>, vector<1x8x128xf32>
    %1 = vector.shape_cast %0 : vector<1x8x128xf32> to vector<8x128xf32>
    %c0_2 = arith.constant 0 : index
    %c0_3 = arith.constant 0 : index
    %c0_4 = arith.constant 0 : index
    %2 = vector.load %arg6[%c0_2, %c0_3, %c0_4] : memref<1x8x8xf32, #tpu.memory_space<vmem>>, vector<1x8x8xf32>
    %3 = vector.shape_cast %2 : vector<1x8x8xf32> to vector<8x8xf32>
    %4 = vector.extract_strided_slice %1 {offsets = [0, 0], sizes = [1, 128], strides = [1, 1]} : vector<8x128xf32> to vector<1x128xf32>
    %5 = vector.extract_strided_slice %1 {offsets = [1, 0], sizes = [1, 128], strides = [1, 1]} : vector<8x128xf32> to vector<1x128xf32>
    %6 = vector.extract_strided_slice %1 {offsets = [2, 0], sizes = [1, 128], strides = [1, 1]} : vector<8x128xf32> to vector<1x128xf32>
    %7 = vector.extract_strided_slice %1 {offsets = [3, 0], sizes = [1, 128], strides = [1, 1]} : vector<8x128xf32> to vector<1x128xf32>
    %8 = vector.extract_strided_slice %1 {offsets = [4, 0], sizes = [1, 128], strides = [1, 1]} : vector<8x128xf32> to vector<1x128xf32>
    %9 = vector.extract_strided_slice %1 {offsets = [5, 0], sizes = [1, 128], strides = [1, 1]} : vector<8x128xf32> to vector<1x128xf32>
    %10 = vector.extract_strided_slice %1 {offsets = [6, 0], sizes = [1, 128], strides = [1, 1]} : vector<8x128xf32> to vector<1x128xf32>
    %11 = vector.extract_strided_slice %1 {offsets = [7, 0], sizes = [1, 128], strides = [1, 1]} : vector<8x128xf32> to vector<1x128xf32>
    %12 = vector.extract_strided_slice %3 {offsets = [0, 0], sizes = [8, 1], strides = [1, 1]} : vector<8x8xf32> to vector<8x1xf32>
    %13 = vector.extract_strided_slice %3 {offsets = [0, 1], sizes = [8, 1], strides = [1, 1]} : vector<8x8xf32> to vector<8x1xf32>
    %14 = vector.extract_strided_slice %3 {offsets = [0, 2], sizes = [8, 1], strides = [1, 1]} : vector<8x8xf32> to vector<8x1xf32>
    %15 = vector.extract_strided_slice %3 {offsets = [0, 3], sizes = [8, 1], strides = [1, 1]} : vector<8x8xf32> to vector<8x1xf32>
    %16 = vector.extract_strided_slice %3 {offsets = [0, 4], sizes = [8, 1], strides = [1, 1]} : vector<8x8xf32> to vector<8x1xf32>
    %17 = vector.extract_strided_slice %3 {offsets = [0, 5], sizes = [8, 1], strides = [1, 1]} : vector<8x8xf32> to vector<8x1xf32>
    %18 = vector.extract_strided_slice %3 {offsets = [0, 6], sizes = [8, 1], strides = [1, 1]} : vector<8x8xf32> to vector<8x1xf32>
    %19 = vector.extract_strided_slice %3 {offsets = [0, 7], sizes = [8, 1], strides = [1, 1]} : vector<8x8xf32> to vector<8x1xf32>
    %20 = arith.addf %4, %6 : vector<1x128xf32>
    %cst = arith.constant 5.000000e-01 : f32
    %21 = vector.broadcast %cst : f32 to vector<1x128xf32>
    %22 = arith.mulf %20, %21 : vector<1x128xf32>
    %23 = arith.addf %5, %7 : vector<1x128xf32>
    %cst_5 = arith.constant 5.000000e-01 : f32
    %24 = vector.broadcast %cst_5 : f32 to vector<1x128xf32>
    %25 = arith.mulf %23, %24 : vector<1x128xf32>
    %26 = arith.addf %12, %14 : vector<8x1xf32>
    %cst_6 = arith.constant 5.000000e-01 : f32
    %27 = vector.broadcast %cst_6 : f32 to vector<8x1xf32>
    %28 = arith.mulf %26, %27 : vector<8x1xf32>
    %29 = arith.addf %13, %15 : vector<8x1xf32>
    %cst_7 = arith.constant 5.000000e-01 : f32
    %30 = vector.broadcast %cst_7 : f32 to vector<8x1xf32>
    %31 = arith.mulf %29, %30 : vector<8x1xf32>
    %32 = arith.subf %14, %12 : vector<8x1xf32>
    %33 = arith.subf %15, %13 : vector<8x1xf32>
    %34 = vector.broadcast %22 : vector<1x128xf32> to vector<8x128xf32>
    %35 = vector.broadcast %12 : vector<8x1xf32> to vector<8x128xf32>
    %36 = arith.cmpf ogt, %34, %35 : vector<8x128xf32>
    %37 = vector.broadcast %22 : vector<1x128xf32> to vector<8x128xf32>
    %38 = vector.broadcast %14 : vector<8x1xf32> to vector<8x128xf32>
    %39 = arith.cmpf olt, %37, %38 : vector<8x128xf32>
    %40 = arith.andi %36, %39 : vector<8x128xi1>
    %41 = vector.broadcast %25 : vector<1x128xf32> to vector<8x128xf32>
    %42 = vector.broadcast %13 : vector<8x1xf32> to vector<8x128xf32>
    %43 = arith.cmpf ogt, %41, %42 : vector<8x128xf32>
    %44 = arith.andi %40, %43 : vector<8x128xi1>
    %45 = vector.broadcast %25 : vector<1x128xf32> to vector<8x128xf32>
    %46 = vector.broadcast %15 : vector<8x1xf32> to vector<8x128xf32>
    %47 = arith.cmpf olt, %45, %46 : vector<8x128xf32>
    %48 = arith.andi %44, %47 : vector<8x128xi1>
    %49 = arith.extui %48 : vector<8x128xi1> to vector<8x128xi32>
    %50 = arith.sitofp %49 : vector<8x128xi32> to vector<8x128xf32>
    %cst_8 = arith.constant dense<0xFF800000> : vector<128xf32>
    %51 = vector.multi_reduction <maximumf>, %50, %cst_8 [0] : vector<8x128xf32> to vector<128xf32>
    %52 = vector.shape_cast %51 : vector<128xf32> to vector<1x128xf32>
    %cst_9 = arith.constant 0.000000e+00 : f32
    %53 = vector.broadcast %cst_9 : f32 to vector<1x128xf32>
    %54 = arith.cmpf ogt, %52, %53 : vector<1x128xf32>
    %cst_10 = arith.constant 2.500000e+00 : f32
    %55 = vector.broadcast %cst_10 : f32 to vector<8x1xf32>
    %56 = arith.mulf %55, %32 : vector<8x1xf32>
    %57 = arith.subf %28, %56 : vector<8x1xf32>
    %58 = vector.broadcast %22 : vector<1x128xf32> to vector<8x128xf32>
    %59 = vector.broadcast %57 : vector<8x1xf32> to vector<8x128xf32>
    %60 = arith.cmpf ogt, %58, %59 : vector<8x128xf32>
    %cst_11 = arith.constant 2.500000e+00 : f32
    %61 = vector.broadcast %cst_11 : f32 to vector<8x1xf32>
    %62 = arith.mulf %61, %32 : vector<8x1xf32>
    %63 = arith.addf %28, %62 : vector<8x1xf32>
    %64 = vector.broadcast %22 : vector<1x128xf32> to vector<8x128xf32>
    %65 = vector.broadcast %63 : vector<8x1xf32> to vector<8x128xf32>
    %66 = arith.cmpf olt, %64, %65 : vector<8x128xf32>
    %67 = arith.andi %60, %66 : vector<8x128xi1>
    %cst_12 = arith.constant 2.500000e+00 : f32
    %68 = vector.broadcast %cst_12 : f32 to vector<8x1xf32>
    %69 = arith.mulf %68, %33 : vector<8x1xf32>
    %70 = arith.subf %31, %69 : vector<8x1xf32>
    %71 = vector.broadcast %25 : vector<1x128xf32> to vector<8x128xf32>
    %72 = vector.broadcast %70 : vector<8x1xf32> to vector<8x128xf32>
    %73 = arith.cmpf ogt, %71, %72 : vector<8x128xf32>
    %74 = arith.andi %67, %73 : vector<8x128xi1>
    %cst_13 = arith.constant 2.500000e+00 : f32
    %75 = vector.broadcast %cst_13 : f32 to vector<8x1xf32>
    %76 = arith.mulf %75, %33 : vector<8x1xf32>
    %77 = arith.addf %31, %76 : vector<8x1xf32>
    %78 = vector.broadcast %25 : vector<1x128xf32> to vector<8x128xf32>
    %79 = vector.broadcast %77 : vector<8x1xf32> to vector<8x128xf32>
    %80 = arith.cmpf olt, %78, %79 : vector<8x128xf32>
    %81 = arith.andi %74, %80 : vector<8x128xi1>
    %82 = arith.extui %81 : vector<8x128xi1> to vector<8x128xi32>
    %83 = arith.sitofp %82 : vector<8x128xi32> to vector<8x128xf32>
    %cst_14 = arith.constant dense<0xFF800000> : vector<128xf32>
    %84 = vector.multi_reduction <maximumf>, %83, %cst_14 [0] : vector<8x128xf32> to vector<128xf32>
    %85 = vector.shape_cast %84 : vector<128xf32> to vector<1x128xf32>
    %cst_15 = arith.constant 0.000000e+00 : f32
    %86 = vector.broadcast %cst_15 : f32 to vector<1x128xf32>
    %87 = arith.cmpf ogt, %85, %86 : vector<1x128xf32>
    %88 = arith.ori %54, %87 : vector<1x128xi1>
    %89 = arith.andi %48, %81 : vector<8x128xi1>
    %90 = vector.broadcast %4 : vector<1x128xf32> to vector<8x128xf32>
    %91 = vector.broadcast %12 : vector<8x1xf32> to vector<8x128xf32>
    %92 = arith.maximumf %90, %91 : vector<8x128xf32>
    %93 = vector.broadcast %5 : vector<1x128xf32> to vector<8x128xf32>
    %94 = vector.broadcast %13 : vector<8x1xf32> to vector<8x128xf32>
    %95 = arith.maximumf %93, %94 : vector<8x128xf32>
    %96 = vector.broadcast %6 : vector<1x128xf32> to vector<8x128xf32>
    %97 = vector.broadcast %14 : vector<8x1xf32> to vector<8x128xf32>
    %98 = arith.minimumf %96, %97 : vector<8x128xf32>
    %99 = vector.broadcast %7 : vector<1x128xf32> to vector<8x128xf32>
    %100 = vector.broadcast %15 : vector<8x1xf32> to vector<8x128xf32>
    %101 = arith.minimumf %99, %100 : vector<8x128xf32>
    %102 = arith.subf %98, %92 : vector<8x128xf32>
    %cst_16 = arith.constant 0.000000e+00 : f32
    %103 = vector.broadcast %cst_16 : f32 to vector<8x128xf32>
    %104 = arith.maximumf %102, %103 : vector<8x128xf32>
    %105 = arith.subf %101, %95 : vector<8x128xf32>
    %cst_17 = arith.constant 0.000000e+00 : f32
    %106 = vector.broadcast %cst_17 : f32 to vector<8x128xf32>
    %107 = arith.maximumf %105, %106 : vector<8x128xf32>
    %108 = arith.mulf %104, %107 : vector<8x128xf32>
    %109 = arith.subf %6, %4 : vector<1x128xf32>
    %110 = arith.subf %7, %5 : vector<1x128xf32>
    %111 = arith.mulf %109, %110 : vector<1x128xf32>
    %112 = arith.subf %14, %12 : vector<8x1xf32>
    %113 = arith.subf %15, %13 : vector<8x1xf32>
    %114 = arith.mulf %112, %113 : vector<8x1xf32>
    %115 = vector.broadcast %111 : vector<1x128xf32> to vector<8x128xf32>
    %116 = vector.broadcast %114 : vector<8x1xf32> to vector<8x128xf32>
    %117 = arith.addf %115, %116 : vector<8x128xf32>
    %118 = arith.subf %117, %108 : vector<8x128xf32>
    %cst_18 = arith.constant 9.99999971E-10 : f32
    %119 = vector.broadcast %cst_18 : f32 to vector<8x128xf32>
    %120 = arith.addf %118, %119 : vector<8x128xf32>
    %121 = tpu.reciprocal %120 {approx = true} : vector<8x128xf32> -> vector<8x128xf32>
    %122 = arith.mulf %108, %121 : vector<8x128xf32>
    %123 = vector.broadcast %4 : vector<1x128xf32> to vector<8x128xf32>
    %124 = vector.broadcast %12 : vector<8x1xf32> to vector<8x128xf32>
    %125 = arith.minimumf %123, %124 : vector<8x128xf32>
    %126 = vector.broadcast %5 : vector<1x128xf32> to vector<8x128xf32>
    %127 = vector.broadcast %13 : vector<8x1xf32> to vector<8x128xf32>
    %128 = arith.minimumf %126, %127 : vector<8x128xf32>
    %129 = vector.broadcast %6 : vector<1x128xf32> to vector<8x128xf32>
    %130 = vector.broadcast %14 : vector<8x1xf32> to vector<8x128xf32>
    %131 = arith.maximumf %129, %130 : vector<8x128xf32>
    %132 = vector.broadcast %7 : vector<1x128xf32> to vector<8x128xf32>
    %133 = vector.broadcast %15 : vector<8x1xf32> to vector<8x128xf32>
    %134 = arith.maximumf %132, %133 : vector<8x128xf32>
    %135 = arith.subf %131, %125 : vector<8x128xf32>
    %136 = arith.subf %134, %128 : vector<8x128xf32>
    %137 = arith.mulf %135, %136 : vector<8x128xf32>
    %138 = arith.subf %137, %118 : vector<8x128xf32>
    %cst_19 = arith.constant 9.99999971E-10 : f32
    %139 = vector.broadcast %cst_19 : f32 to vector<8x128xf32>
    %140 = arith.addf %137, %139 : vector<8x128xf32>
    %141 = tpu.reciprocal %140 {approx = true} : vector<8x128xf32> -> vector<8x128xf32>
    %142 = arith.mulf %138, %141 : vector<8x128xf32>
    %143 = arith.subf %122, %142 : vector<8x128xf32>
    %144 = vector.broadcast %8 : vector<1x128xf32> to vector<8x128xf32>
    %145 = vector.broadcast %16 : vector<8x1xf32> to vector<8x128xf32>
    %146 = arith.subf %144, %145 : vector<8x128xf32>
    %147 = math.absf %146 : vector<8x128xf32>
    %148 = vector.broadcast %9 : vector<1x128xf32> to vector<8x128xf32>
    %149 = vector.broadcast %17 : vector<8x1xf32> to vector<8x128xf32>
    %150 = arith.subf %148, %149 : vector<8x128xf32>
    %151 = math.absf %150 : vector<8x128xf32>
    %152 = arith.addf %147, %151 : vector<8x128xf32>
    %153 = vector.broadcast %10 : vector<1x128xf32> to vector<8x128xf32>
    %154 = vector.broadcast %18 : vector<8x1xf32> to vector<8x128xf32>
    %155 = arith.subf %153, %154 : vector<8x128xf32>
    %156 = math.absf %155 : vector<8x128xf32>
    %157 = arith.addf %152, %156 : vector<8x128xf32>
    %158 = vector.broadcast %11 : vector<1x128xf32> to vector<8x128xf32>
    %159 = vector.broadcast %19 : vector<8x1xf32> to vector<8x128xf32>
    %160 = arith.subf %158, %159 : vector<8x128xf32>
    %161 = math.absf %160 : vector<8x128xf32>
    %162 = arith.addf %157, %161 : vector<8x128xf32>
    %c0_20 = arith.constant 0 : index
    %c0_21 = arith.constant 0 : index
    %c0_22 = arith.constant 0 : index
    %163 = vector.load %arg7[%c0_20, %c0_21, %c0_22] : memref<1x24x8xbf16, #tpu.memory_space<vmem>>, vector<1x24x8xbf16>
    %164 = vector.shape_cast %163 : vector<1x24x8xbf16> to vector<24x8xbf16>
    %c0_23 = arith.constant 0 : index
    %c0_24 = arith.constant 0 : index
    %c0_25 = arith.constant 0 : index
    %165 = vector.load %arg2[%c0_23, %c0_24, %c0_25] : memref<1x128x8xbf16, #tpu.memory_space<vmem>>, vector<1x128x8xbf16>
    %166 = vector.shape_cast %165 : vector<1x128x8xbf16> to vector<128x8xbf16>
    %167 = vector.extract_strided_slice %164 {offsets = [0, 0], sizes = [8, 8], strides = [1, 1]} : vector<24x8xbf16> to vector<8x8xbf16>
    %cst_26 = arith.constant dense<0.000000e+00> : vector<8x128xf32>
    %168 = tpu.matmul %167, %166, %cst_26 {dimension_numbers = #tpu.dot_dimension_numbers<[1], [1], [0], [0], [0, 0, 1, 0], [], []>} : vector<8x8xbf16>, vector<128x8xbf16>, vector<8x128xf32> -> vector<8x128xf32>
    %169 = arith.negf %168 : vector<8x128xf32>
    %170 = math.exp %169 : vector<8x128xf32>
    %cst_27 = arith.constant 1.000000e+00 : f32
    %171 = vector.broadcast %cst_27 : f32 to vector<8x128xf32>
    %172 = arith.addf %171, %170 : vector<8x128xf32>
    %173 = arith.divf %171, %172 : vector<8x128xf32>
    %174 = arith.mulf %173, %173 : vector<8x128xf32>
    %cst_28 = arith.constant 1.000000e+00 : f32
    %175 = vector.broadcast %cst_28 : f32 to vector<8x128xf32>
    %176 = arith.subf %175, %173 : vector<8x128xf32>
    %cst_29 = arith.constant 1.000000e+00 : f32
    %177 = vector.broadcast %cst_29 : f32 to vector<8x128xf32>
    %178 = arith.subf %177, %173 : vector<8x128xf32>
    %179 = arith.mulf %176, %178 : vector<8x128xf32>
    %cst_30 = arith.constant 7.500000e-01 : f32
    %180 = vector.broadcast %cst_30 : f32 to vector<8x128xf32>
    %181 = arith.mulf %180, %174 : vector<8x128xf32>
    %cst_31 = arith.constant 1.000000e+00 : f32
    %182 = vector.broadcast %cst_31 : f32 to vector<8x128xf32>
    %183 = arith.subf %182, %173 : vector<8x128xf32>
    %cst_32 = arith.constant 9.99999993E-9 : f32
    %184 = vector.broadcast %cst_32 : f32 to vector<8x128xf32>
    %185 = arith.addf %183, %184 : vector<8x128xf32>
    %186 = math.log %185 : vector<8x128xf32>
    %cst_33 = arith.constant 0.000000e+00 : f32
    %187 = vector.broadcast %cst_33 : f32 to vector<8x128xf32>
    %188 = arith.subf %187, %186 : vector<8x128xf32>
    %189 = arith.mulf %181, %188 : vector<8x128xf32>
    %cst_34 = arith.constant 2.500000e-01 : f32
    %190 = vector.broadcast %cst_34 : f32 to vector<8x128xf32>
    %191 = arith.mulf %190, %179 : vector<8x128xf32>
    %cst_35 = arith.constant 9.99999993E-9 : f32
    %192 = vector.broadcast %cst_35 : f32 to vector<8x128xf32>
    %193 = arith.addf %173, %192 : vector<8x128xf32>
    %194 = math.log %193 : vector<8x128xf32>
    %cst_36 = arith.constant 0.000000e+00 : f32
    %195 = vector.broadcast %cst_36 : f32 to vector<8x128xf32>
    %196 = arith.subf %195, %194 : vector<8x128xf32>
    %197 = arith.mulf %191, %196 : vector<8x128xf32>
    %198 = arith.subf %197, %189 : vector<8x128xf32>
    %c0_37 = arith.constant 0 : index
    %c0_38 = arith.constant 0 : index
    %c0_39 = arith.constant 0 : index
    %199 = vector.load %arg3[%c0_37, %c0_38, %c0_39] : memref<1x128x8xbf16, #tpu.memory_space<vmem>>, vector<1x128x8xbf16>
    %200 = vector.shape_cast %199 : vector<1x128x8xbf16> to vector<128x8xbf16>
    %201 = vector.extract_strided_slice %164 {offsets = [8, 0], sizes = [8, 8], strides = [1, 1]} : vector<24x8xbf16> to vector<8x8xbf16>
    %cst_40 = arith.constant dense<0.000000e+00> : vector<8x128xf32>
    %202 = tpu.matmul %201, %200, %cst_40 {dimension_numbers = #tpu.dot_dimension_numbers<[1], [1], [0], [0], [0, 0, 1, 0], [], []>} : vector<8x8xbf16>, vector<128x8xbf16>, vector<8x128xf32> -> vector<8x128xf32>
    %203 = arith.negf %202 : vector<8x128xf32>
    %204 = math.exp %203 : vector<8x128xf32>
    %cst_41 = arith.constant 1.000000e+00 : f32
    %205 = vector.broadcast %cst_41 : f32 to vector<8x128xf32>
    %206 = arith.addf %205, %204 : vector<8x128xf32>
    %207 = arith.divf %205, %206 : vector<8x128xf32>
    %208 = arith.mulf %207, %207 : vector<8x128xf32>
    %cst_42 = arith.constant 1.000000e+00 : f32
    %209 = vector.broadcast %cst_42 : f32 to vector<8x128xf32>
    %210 = arith.subf %209, %207 : vector<8x128xf32>
    %cst_43 = arith.constant 1.000000e+00 : f32
    %211 = vector.broadcast %cst_43 : f32 to vector<8x128xf32>
    %212 = arith.subf %211, %207 : vector<8x128xf32>
    %213 = arith.mulf %210, %212 : vector<8x128xf32>
    %cst_44 = arith.constant 7.500000e-01 : f32
    %214 = vector.broadcast %cst_44 : f32 to vector<8x128xf32>
    %215 = arith.mulf %214, %208 : vector<8x128xf32>
    %cst_45 = arith.constant 1.000000e+00 : f32
    %216 = vector.broadcast %cst_45 : f32 to vector<8x128xf32>
    %217 = arith.subf %216, %207 : vector<8x128xf32>
    %cst_46 = arith.constant 9.99999993E-9 : f32
    %218 = vector.broadcast %cst_46 : f32 to vector<8x128xf32>
    %219 = arith.addf %217, %218 : vector<8x128xf32>
    %220 = math.log %219 : vector<8x128xf32>
    %cst_47 = arith.constant 0.000000e+00 : f32
    %221 = vector.broadcast %cst_47 : f32 to vector<8x128xf32>
    %222 = arith.subf %221, %220 : vector<8x128xf32>
    %223 = arith.mulf %215, %222 : vector<8x128xf32>
    %cst_48 = arith.constant 2.500000e-01 : f32
    %224 = vector.broadcast %cst_48 : f32 to vector<8x128xf32>
    %225 = arith.mulf %224, %213 : vector<8x128xf32>
    %cst_49 = arith.constant 9.99999993E-9 : f32
    %226 = vector.broadcast %cst_49 : f32 to vector<8x128xf32>
    %227 = arith.addf %207, %226 : vector<8x128xf32>
    %228 = math.log %227 : vector<8x128xf32>
    %cst_50 = arith.constant 0.000000e+00 : f32
    %229 = vector.broadcast %cst_50 : f32 to vector<8x128xf32>
    %230 = arith.subf %229, %228 : vector<8x128xf32>
    %231 = arith.mulf %225, %230 : vector<8x128xf32>
    %232 = arith.subf %231, %223 : vector<8x128xf32>
    %233 = arith.addf %198, %232 : vector<8x128xf32>
    %c0_51 = arith.constant 0 : index
    %c0_52 = arith.constant 0 : index
    %c0_53 = arith.constant 0 : index
    %234 = vector.load %arg4[%c0_51, %c0_52, %c0_53] : memref<1x128x8xbf16, #tpu.memory_space<vmem>>, vector<1x128x8xbf16>
    %235 = vector.shape_cast %234 : vector<1x128x8xbf16> to vector<128x8xbf16>
    %236 = vector.extract_strided_slice %164 {offsets = [16, 0], sizes = [8, 8], strides = [1, 1]} : vector<24x8xbf16> to vector<8x8xbf16>
    %cst_54 = arith.constant dense<0.000000e+00> : vector<8x128xf32>
    %237 = tpu.matmul %236, %235, %cst_54 {dimension_numbers = #tpu.dot_dimension_numbers<[1], [1], [0], [0], [0, 0, 1, 0], [], []>} : vector<8x8xbf16>, vector<128x8xbf16>, vector<8x128xf32> -> vector<8x128xf32>
    %238 = arith.negf %237 : vector<8x128xf32>
    %239 = math.exp %238 : vector<8x128xf32>
    %cst_55 = arith.constant 1.000000e+00 : f32
    %240 = vector.broadcast %cst_55 : f32 to vector<8x128xf32>
    %241 = arith.addf %240, %239 : vector<8x128xf32>
    %242 = arith.divf %240, %241 : vector<8x128xf32>
    %243 = arith.mulf %242, %242 : vector<8x128xf32>
    %cst_56 = arith.constant 1.000000e+00 : f32
    %244 = vector.broadcast %cst_56 : f32 to vector<8x128xf32>
    %245 = arith.subf %244, %242 : vector<8x128xf32>
    %cst_57 = arith.constant 1.000000e+00 : f32
    %246 = vector.broadcast %cst_57 : f32 to vector<8x128xf32>
    %247 = arith.subf %246, %242 : vector<8x128xf32>
    %248 = arith.mulf %245, %247 : vector<8x128xf32>
    %cst_58 = arith.constant 7.500000e-01 : f32
    %249 = vector.broadcast %cst_58 : f32 to vector<8x128xf32>
    %250 = arith.mulf %249, %243 : vector<8x128xf32>
    %cst_59 = arith.constant 1.000000e+00 : f32
    %251 = vector.broadcast %cst_59 : f32 to vector<8x128xf32>
    %252 = arith.subf %251, %242 : vector<8x128xf32>
    %cst_60 = arith.constant 9.99999993E-9 : f32
    %253 = vector.broadcast %cst_60 : f32 to vector<8x128xf32>
    %254 = arith.addf %252, %253 : vector<8x128xf32>
    %255 = math.log %254 : vector<8x128xf32>
    %cst_61 = arith.constant 0.000000e+00 : f32
    %256 = vector.broadcast %cst_61 : f32 to vector<8x128xf32>
    %257 = arith.subf %256, %255 : vector<8x128xf32>
    %258 = arith.mulf %250, %257 : vector<8x128xf32>
    %cst_62 = arith.constant 2.500000e-01 : f32
    %259 = vector.broadcast %cst_62 : f32 to vector<8x128xf32>
    %260 = arith.mulf %259, %248 : vector<8x128xf32>
    %cst_63 = arith.constant 9.99999993E-9 : f32
    %261 = vector.broadcast %cst_63 : f32 to vector<8x128xf32>
    %262 = arith.addf %242, %261 : vector<8x128xf32>
    %263 = math.log %262 : vector<8x128xf32>
    %cst_64 = arith.constant 0.000000e+00 : f32
    %264 = vector.broadcast %cst_64 : f32 to vector<8x128xf32>
    %265 = arith.subf %264, %263 : vector<8x128xf32>
    %266 = arith.mulf %260, %265 : vector<8x128xf32>
    %267 = arith.subf %266, %258 : vector<8x128xf32>
    %268 = arith.addf %233, %267 : vector<8x128xf32>
    %cst_65 = arith.constant 0.333333343 : f32
    %269 = vector.broadcast %cst_65 : f32 to vector<8x128xf32>
    %270 = arith.mulf %268, %269 : vector<8x128xf32>
    %271 = arith.extui %89 : vector<8x128xi1> to vector<8x128xi32>
    %272 = arith.sitofp %271 : vector<8x128xi32> to vector<8x128xf32>
    %cst_66 = arith.constant 1.000000e+00 : f32
    %273 = vector.broadcast %cst_66 : f32 to vector<8x128xf32>
    %274 = arith.subf %273, %272 : vector<8x128xf32>
    %275 = arith.extui %88 : vector<1x128xi1> to vector<1x128xi32>
    %276 = arith.sitofp %275 : vector<1x128xi32> to vector<1x128xf32>
    %cst_67 = arith.constant 1.000000e+00 : f32
    %277 = vector.broadcast %cst_67 : f32 to vector<1x128xf32>
    %278 = arith.subf %277, %276 : vector<1x128xf32>
    %cst_68 = arith.constant 1.000000e+00 : f32
    %279 = vector.broadcast %cst_68 : f32 to vector<8x128xf32>
    %280 = arith.mulf %279, %162 : vector<8x128xf32>
    %281 = arith.addf %280, %270 : vector<8x128xf32>
    %cst_69 = arith.constant 0.000000e+00 : f32
    %282 = vector.broadcast %cst_69 : f32 to vector<8x128xf32>
    %283 = arith.subf %282, %143 : vector<8x128xf32>
    %cst_70 = arith.constant 1.000000e+00 : f32
    %284 = vector.broadcast %cst_70 : f32 to vector<8x128xf32>
    %285 = arith.mulf %284, %283 : vector<8x128xf32>
    %286 = arith.addf %281, %285 : vector<8x128xf32>
    %cst_71 = arith.constant 1.000000e+02 : f32
    %287 = vector.broadcast %cst_71 : f32 to vector<8x128xf32>
    %288 = arith.mulf %287, %274 : vector<8x128xf32>
    %289 = arith.addf %286, %288 : vector<8x128xf32>
    %cst_72 = arith.constant 1.000000e+04 : f32
    %290 = vector.broadcast %cst_72 : f32 to vector<1x128xf32>
    %291 = arith.mulf %290, %278 : vector<1x128xf32>
    %292 = vector.broadcast %291 : vector<1x128xf32> to vector<8x128xf32>
    %293 = arith.addf %289, %292 : vector<8x128xf32>
    %c0_73 = arith.constant 0 : index
    %c0_74 = arith.constant 0 : index
    %c0_75 = arith.constant 0 : index
    %294 = vector.load %arg8[%c0_73, %c0_74, %c0_75] : memref<1x8x128xf32, #tpu.memory_space<vmem>>, vector<1x8x128xf32>
    %295 = vector.shape_cast %294 : vector<1x8x128xf32> to vector<8x128xf32>
    %296 = vector.shape_cast %293 : vector<8x128xf32> to vector<1x8x128xf32>
    tpu.vector_store %arg8[%c0_73, %c0_74, %c0_75], %296 {strides = array<i32>} : memref<1x8x128xf32, #tpu.memory_space<vmem>>, vector<1x8x128xf32>,
    %c0_76 = arith.constant 0 : index
    %c0_77 = arith.constant 0 : index
    %c0_78 = arith.constant 0 : index
    %297 = vector.load %arg9[%c0_76, %c0_77, %c0_78] : memref<1x8x128xf32, #tpu.memory_space<vmem>>, vector<1x8x128xf32>
    %298 = vector.shape_cast %297 : vector<1x8x128xf32> to vector<8x128xf32>
    %299 = vector.shape_cast %122 : vector<8x128xf32> to vector<1x8x128xf32>
    tpu.vector_store %arg9[%c0_76, %c0_77, %c0_78], %299 {strides = array<i32>} : memref<1x8x128xf32, #tpu.memory_space<vmem>>, vector<1x8x128xf32>,
    return
  }
  func.func @transform_0(%arg0: i32, %arg1: i32) -> (i32, i32, i32) {
    %c0_i32 = arith.constant 0 : i32
    %c0_i32_0 = arith.constant 0 : i32
    return %arg0, %arg1, %c0_i32 : i32, i32, i32
  }
  func.func @transform_1(%arg0: i32, %arg1: i32) -> (i32, i32, i32) {
    %c0_i32 = arith.constant 0 : i32
    %c0_i32_0 = arith.constant 0 : i32
    return %arg0, %arg1, %c0_i32 : i32, i32, i32
  }
  func.func @transform_2(%arg0: i32, %arg1: i32) -> (i32, i32, i32) {
    %c0_i32 = arith.constant 0 : i32
    %c0_i32_0 = arith.constant 0 : i32
    return %arg0, %arg1, %c0_i32 : i32, i32, i32
  }
  func.func @transform_3(%arg0: i32, %arg1: i32) -> (i32, i32, i32) {
    %c0_i32 = arith.constant 0 : i32
    %c0_i32_0 = arith.constant 0 : i32
    return %arg0, %c0_i32, %arg1 : i32, i32, i32
  }
  func.func @transform_4(%arg0: i32, %arg1: i32) -> (i32, i32, i32) {
    %c0_i32 = arith.constant 0 : i32
    %c0_i32_0 = arith.constant 0 : i32
    %c0_i32_1 = arith.constant 0 : i32
    return %arg0, %c0_i32, %c0_i32_0 : i32, i32, i32
  }
  func.func @transform_5(%arg0: i32, %arg1: i32) -> (i32, i32, i32) {
    %c0_i32 = arith.constant 0 : i32
    %c0_i32_0 = arith.constant 0 : i32
    %c0_i32_1 = arith.constant 0 : i32
    return %arg0, %c0_i32, %c0_i32_0 : i32, i32, i32
  }
  func.func @transform_6(%arg0: i32, %arg1: i32) -> (i32, i32, i32) {
    %c0_i32 = arith.constant 0 : i32
    %c0_i32_0 = arith.constant 0 : i32
    return %arg0, %c0_i32, %arg1 : i32, i32, i32
  }
  func.func @transform_7(%arg0: i32, %arg1: i32) -> (i32, i32, i32) {
    %c0_i32 = arith.constant 0 : i32
    %c0_i32_0 = arith.constant 0 : i32
    return %arg0, %c0_i32, %arg1 : i32, i32, i32
  }
}

</mosaic_0001>

<bundles_post_ra>
// kernel: tpu_custom_call.1
= control target key start
LH: loop header
LB: loop body
LE: loop exit
PB: predicated region body
PF: predicated region fallthrough
CT: control target
= control target key end

     0   :  { %13 = vsyncpa [#allocation3], 0  ;;  %s2137_s0 = inlined_call_operand.vmem [shape: bf16[2,128,8], index: 0, kind: input, shape index: {}]   ;;  %s2138_s1 = inlined_call_operand.vmem [shape: bf16[2,128,8], index: 1, kind: input, shape index: {}]   ;;  %s2139_s2 = inlined_call_operand.vmem [shape: bf16[2,128,8], index: 2, kind: input, shape index: {}]   ;;  %s2140_s3 = inlined_call_operand.vmem [shape: f32[2,8,128], index: 3, kind: input, shape index: {}]   ;;  %s2141_s4 = inlined_call_operand.vmem [shape: f32[2,8,8], index: 4, kind: input, shape index: {}]   ;;  %s2142_s5 = inlined_call_operand.vmem [shape: bf16[2,24,8], index: 5, kind: input, shape index: {}]   ;;  %s2143_s6 = inlined_call_operand.hbm [shape: f32[2,8,128], index: 6, kind: output, shape index: {0}]   ;;  %s2144_s7 = inlined_call_operand.hbm [shape: f32[2,8,128], index: 7, kind: output, shape index: {1}]  }
   0x1   :  { %15 = vsyncpa [#allocation3 + $0x1], 0 }
   0x2   :  { %16 = vsyncpa [#allocation5], 0 }
   0x3   :  { %18 = vsyncpa [#allocation5 + $0x1], 0  ;;  %s1788_s24 = smov 0   ;;  %s1790_s25 = smov 0  }
   0x4   :  { %s1792_s26 = smov 0   ;;  %s1794_s27 = smov 0  }
   0x5   :  { %s1796_s28 = smov 0   ;;  %s1798_s29 = smov 0  }
   0x6 LB: > { %s1337_s30 = sadd.s32 4294967295, %s1731_s29   ;;  %s1338_s8 = sadd.s32 4294967294, %s1731_s29   ;;  %s1731_s29 = sphi %s1798_s29, %s24_s29   ;;  %s1727_s28 = sphi %s1796_s28, %s2157_s28   ;;  %s1723_s27 = sphi %s1794_s27, %s2156_s27   ;;  %s1719_s26 = sphi %s1792_s26, %s2155_s26   ;;  %s1715_s25 = sphi %s1790_s25, %s2154_s25   ;;  %s1711_s24 = sphi %s1788_s24, %s2153_s24  }
   0x7   : > { %s36_s9 = sadd.s32 1, %s1727_s28  ;;  %s209_s10 = sadd.s32 1, %s1719_s26 }
   0x8   : > { %p38_p0 = scmp.ge.s32.totalorder %s36_s9, 2  ;;  %p219_p1 = scmp.ne.s32.totalorder %s1719_s26, %s1715_s25 }
   0x9   : > { %p220_p2 = scmp.eq.s32.totalorder %s1337_s30, 1  ;;  %p225_p3 = scmp.ne.s32.totalorder %s1715_s25, %s1711_s24 }
   0xa   : > { %s2159_s9 = smov (%p38_p0, %s36_s9), 0  ;;  %p226_p5 = scmp.eq.s32.totalorder %s1338_s8, 1 }
   0xb   : > { %p1828_p4 = por %p220_p2, %p219_p1  ;;  %s204_s12 = ssub.s32 %s1727_s28, %s2159_s9 }
   0xc   : > { %p1341_p6 = scmp.ge.s32.totalorder %s1731_s29, 1  ;;  %p207_p7 = scmp.eq.s32.totalorder %s204_s12, 0 }
   0xd   : > { %p1835_p8 = por %p226_p5, %p225_p3  ;;  %p336_p9 = scmp.lt.s32.totalorder %s1731_s29, 3 }
   0xe   : > { %s1841_s14 = scalar_select %p207_p7, %s1719_s26, %s209_s10  }
   0xf   : > { %p337_p10 = pnand %p1341_p6, %p336_p9 }
  0x10   : > { %p412_p11 = scmp.lt.s32.totalorder (!%p337_p10), %s1723_s27, 1  ;;  %v1733_v0 = vmov (!%p337_p10), 0.0   ;;  %vm1734_vm0 = vmmov (!%p337_p10), 0   ;;  %vm723_vm1 = vcmask (!%p337_p10), 64512   ;;  %s1735_s12 = smov (!%p337_p10), 2   ;;  %v1737_v18 = vmov (!%p337_p10), 2  }
  0x11   : > { %340 = sbr.rel (%p337_p10) target bundleno = 457 (0x1c9), region = 44  ;;  %1423 = vmatprep.subr.bf16.mxu0 (!%p337_p10), %v1733_v0  ;;  %1443 = vmatprep.subr.bf16.mxu1 (!%p337_p10), %v1733_v0  ;;  %s1736_s18 = smov (!%p337_p10), 126   ;;  %v1738_v19 = vmov (!%p337_p10), 0   ;;  %v1739_v22 = vmov (!%p337_p10), 3   ;;  %v1741_v59 = vmov (!%p337_p10), 1  }
  0x12   : > { %1439 = vmatprep.mubr.msk.bf16.mxu0 (!%p337_p10), %vm1734_vm0, %v1733_v0  ;;  %1459 = vmatprep.mubr.msk.bf16.mxu1 (!%p337_p10), %vm1734_vm0, %v1733_v0  ;;  %s2145_s19 = sshll.u32 (!%p337_p10), %s1723_s27, 7 }
  0x13   : > { %1558 = vset.pattern.permute.xlu1 (!%p337_p10), %v1737_v18  ;;  %1557 = vset.pattern.permute.xlu0 (!%p337_p10), %v1738_v19  ;;  %s2043_s30 = scalar_lea.hbm (!%p337_p10), %s2144_s7, %s2145_s19 }
  0x18   : > { %s1847_s15 = scalar_select %p412_p11, %s1723_s27, 1 }
  0x1a   : > { %s1350_s16 = sshll.u32 %s1847_s15, 3  ;;  %s1393_s17 = sshll.u32 %s1847_s15, 6 }
  0x1b   : > { %s451_s20 = scalar_lea.vmem %s2141_s4, %s1350_s16  ;;  %s1863_s23 = scalar_lea.vmem %s2137_s0, %s1393_s17 }
  0x1c   : > { %v1865_v1 = vld [vmem:[%s451_s20] sm:$0xff]  ;;  %s1870_s10 = scalar_lea.vmem %s2138_s1, %s1393_s17  ;;  %v1571_v6 = vld [vmem:[%s1863_s23 + $0x8] sm:$0xff]   ;;  %v1573_v10 = vld [vmem:[%s1863_s23 + $0x10] sm:$0xff]   ;;  %s1892_s21 = scalar_lea.vmem %s2139_s2, %s1393_s17 }
  0x1d   : > { %471 = vrot.lane.b32.xlu0 %v1865_v1, %s1735_s12  ;;  %v1569_v2 = vld [vmem:[%s1863_s23] sm:$0xff]   ;;  %v1572_v7 = vld [vmem:[%s1870_s10 + $0x8] sm:$0xff]   ;;  %v731_v8 = vsel %vm723_vm1, %v1571_v6, 0  ;;  %v1574_v11 = vld [vmem:[%s1870_s10 + $0x10] sm:$0xff]   ;;  %v734_v12 = vsel %vm723_vm1, %v1573_v10, 0  ;;  %s1483_s17 = smul.u32 12, %s1847_s15 }
  0x1e   : > { %v1570_v3 = vld [vmem:[%s1870_s10] sm:$0xff]   ;;  %v728_v4 = vsel %vm723_vm1, %v1569_v2, 0  ;;  %v876_v9 = vsel %vm723_vm1, %v1572_v7, 0  ;;  %v879_v13 = vsel %vm723_vm1, %v1574_v11, 0  ;;  %v1575_v14 = vld [vmem:[%s1863_s23 + $0x18] sm:$0xff]   ;;  %v1579_v25 = vld [vmem:[%s1863_s23 + $0x28] sm:$0xff]  }
  0x1f   : > { %1424 = vmatpush3.bf16.xpose.msra.mxu0 %v728_v4  ;;  %v873_v5 = vsel %vm723_vm1, %v1570_v3, 0  ;;  %v1576_v15 = vld [vmem:[%s1870_s10 + $0x18] sm:$0xff]   ;;  %v737_v16 = vsel %vm723_vm1, %v1575_v14, 0  ;;  %v1577_v20 = vld [vmem:[%s1863_s23 + $0x20] sm:$0xff]   ;;  %v1580_v26 = vld [vmem:[%s1870_s10 + $0x28] sm:$0xff]   ;;  %v743_v27 = vsel %vm723_vm1, %v1579_v25, 0  ;;  %s1935_s8 = scalar_lea.vmem %s2142_s5, %s1483_s17 }
  0x20   : > { %1444 = vmatpush3.bf16.xpose.msra.mxu1 %v873_v5  ;;  %1425 = vmatprep.subr.bf16.mxu0 %v1733_v0  ;;  %v882_v17 = vsel %vm723_vm1, %v1576_v15, 0  ;;  %v1578_v21 = vld [vmem:[%s1870_s10 + $0x20] sm:$0xff]   ;;  %v740_v23 = vsel %vm723_vm1, %v1577_v20, 0  ;;  %v888_v28 = vsel %vm723_vm1, %v1580_v26, 0  ;;  %v1581_v29 = vld [vmem:[%s1863_s23 + $0x30] sm:$0xff]   ;;  %v1583_v33 = vld [vmem:[%s1863_s23 + $0x38] sm:$0xff]  }
  0x21   : > { %1445 = vmatprep.subr.bf16.mxu1 %v1733_v0  ;;  %466 = vrot.lane.b32.xlu0 %v1865_v1, %s1736_s18  ;;  %v885_v24 = vsel %vm723_vm1, %v1578_v21, 0  ;;  %v1582_v30 = vld [vmem:[%s1870_s10 + $0x30] sm:$0xff]   ;;  %v746_v31 = vsel %vm723_vm1, %v1581_v29, 0  ;;  %v1584_v34 = vld [vmem:[%s1870_s10 + $0x38] sm:$0xff]   ;;  %v749_v35 = vsel %vm723_vm1, %v1583_v33, 0  ;;  %v1585_v37 = vld [vmem:[%s1892_s21] sm:$0xff]  }
  0x22   : > { %v891_v32 = vsel %vm723_vm1, %v1582_v30, 0  ;;  %v894_v36 = vsel %vm723_vm1, %v1584_v34, 0  ;;  %v664_v38 = vld [vmem:[%s1935_s8] sm:$0xf]  ;;  %v665_v39 = vld [vmem:[%s1935_s8 + $0x4] sm:$0xf] }
  0x23   : > { %v1019_v40 = vsel %vm723_vm1, %v1585_v37, 0  ;;  %v1586_v41 = vld [vmem:[%s1892_s21 + $0x8] sm:$0xff]   ;;  %v1587_v43 = vld [vmem:[%s1892_s21 + $0x10] sm:$0xff]   ;;  %v1588_v45 = vld [vmem:[%s1892_s21 + $0x18] sm:$0xff]   ;;  %s1740_s23 = smov 127   ;;  %v1742_v6 = vmov 4  }
  0x24   : > { %v1022_v42 = vsel %vm723_vm1, %v1586_v41, 0  ;;  %v1025_v44 = vsel %vm723_vm1, %v1587_v43, 0  ;;  %v1028_v46 = vsel %vm723_vm1, %v1588_v45, 0  ;;  %v1589_v47 = vld [vmem:[%s1892_s21 + $0x20] sm:$0xff]   ;;  %v1590_v49 = vld [vmem:[%s1892_s21 + $0x28] sm:$0xff]   ;;  %v1591_v51 = vld [vmem:[%s1892_s21 + $0x30] sm:$0xff]  }
  0x25   : > { %480 = vperm.xlu0 %1557, %v1865_v1   ;;  %v1031_v48 = vsel %vm723_vm1, %v1589_v47, 0  ;;  %v1034_v50 = vsel %vm723_vm1, %v1590_v49, 0  ;;  %v1037_v52 = vsel %vm723_vm1, %v1591_v51, 0  ;;  %v1592_v55 = vld [vmem:[%s1892_s21 + $0x38] sm:$0xff]   ;;  %v666_v58 = vld [vmem:[%s1935_s8 + $0x8] sm:$0xf] }
  0x26   : > { %v1040_v57 = vsel %vm723_vm1, %v1592_v55, 0  ;;  %v1743_v7 = vmov 7   ;;  %s2016_s15 = sand.u32 1, %s1715_s25   ;;  %s1746_s10 = smov [#allocation4]  }
  0x27   : > { %1426 = vmatpush3.bf16.xpose.msra.mxu0 %v731_v8  ;;  %v1744_v8 = vmov 5   ;;  %s1127_s8 = scalar_lea.sflag [#allocation5], %s2016_s15  ;;  %s1625_s12 = sshll.u32 %s1746_s10, 4  ;;  %s1626_s12 = int_to_ptr.vmem [resolvable:$false] %s1625_s12 }
  0x28   : > { %1446 = vmatpush3.bf16.xpose.msra.mxu1 %v876_v9  ;;  %1427 = vmatprep.subr.bf16.mxu0 %v1733_v0  ;;  %v1745_v9 = vmov 6  }
  0x29   : > { %1447 = vmatprep.subr.bf16.mxu1 %v1733_v0  ;;  %1560 = vset.pattern.permute.xlu0 %v1739_v22 }
  0x2a   : > { %501 = vperm.xlu0 %1560, %v1865_v1  }
  0x2e   : > { %1563 = vset.pattern.permute.xlu0 %v1738_v19 }
  0x2f   : > { %1428 = vmatpush3.bf16.xpose.msra.mxu0 %v734_v12 }
  0x30   : > { %1448 = vmatpush3.bf16.xpose.msra.mxu1 %v879_v13  ;;  %1429 = vmatprep.subr.bf16.mxu0 %v1733_v0 }
  0x31   : > { %1449 = vmatprep.subr.bf16.mxu1 %v1733_v0 }
  0x37   : > { %1430 = vmatpush3.bf16.xpose.msra.mxu0 %v737_v16 }
  0x38   : > { %1450 = vmatpush3.bf16.xpose.msra.mxu1 %v882_v17  ;;  %1431 = vmatprep.subr.bf16.mxu0 %v1733_v0 }
  0x39   : > { %1451 = vmatprep.subr.bf16.mxu1 %v1733_v0 }
  0x3f   : > { %1432 = vmatpush3.bf16.xpose.msra.mxu0 %v740_v23 }
  0x40   : > { %1452 = vmatpush3.bf16.xpose.msra.mxu1 %v885_v24  ;;  %1433 = vmatprep.subr.bf16.mxu0 %v1733_v0 }
  0x41   : > { %1453 = vmatprep.subr.bf16.mxu1 %v1733_v0 }
  0x47   : > { %1434 = vmatpush3.bf16.xpose.msra.mxu0 %v743_v27 }
  0x48   : > { %1454 = vmatpush3.bf16.xpose.msra.mxu1 %v888_v28  ;;  %1435 = vmatprep.subr.bf16.mxu0 %v1733_v0 }
  0x49   : > { %1455 = vmatprep.subr.bf16.mxu1 %v1733_v0 }
  0x4f   : > { %1436 = vmatpush3.bf16.xpose.msra.mxu0 %v746_v31 }
  0x50   : > { %1456 = vmatpush3.bf16.xpose.msra.mxu1 %v891_v32  ;;  %1437 = vmatprep.subr.bf16.mxu0 %v1733_v0 }
  0x51   : > { %1457 = vmatprep.subr.bf16.mxu1 %v1733_v0 }
  0x57   : > { %1438 = vmatpush3.bf16.xpose.msra.mxu0 %v749_v35 }
  0x58   : > { %1458 = vmatpush3.bf16.xpose.msra.mxu1 %v894_v36  ;;  %1463 = vmatprep.subr.bf16.mxu0 %v1733_v0 }
  0x5e   : > { %1440 = vmatmul.mubr.msk.bf16.vlgmr.msra.gmra.mrb[0].mxu0 %vm723_vm1, %v664_v38 }
  0x5f   : > { %1460 = vmatmul.mubr.msk.bf16.vlgmr.msra.gmra.mrb[0].mxu1 %vm723_vm1, %v665_v39  ;;  %1464 = vmatpush3.bf16.xpose.msra.mxu0 %v1019_v40 }
  0x60   : > { %1465 = vmatprep.subr.bf16.mxu0 %v1733_v0  ;;  %1479 = vmatprep.mubr.msk.bf16.mxu0 %vm1734_vm0, %v1733_v0 }
  0x67   : > { %1466 = vmatpush3.bf16.xpose.msra.mxu0 %v1022_v42 }
  0x68   : > { %1467 = vmatprep.subr.bf16.mxu0 %v1733_v0 }
  0x6f   : > { %1468 = vmatpush3.bf16.xpose.msra.mxu0 %v1025_v44 }
  0x70   : > { %1469 = vmatprep.subr.bf16.mxu0 %v1733_v0 }
  0x77   : > { %1470 = vmatpush3.bf16.xpose.msra.mxu0 %v1028_v46 }
  0x78   : > { %1471 = vmatprep.subr.bf16.mxu0 %v1733_v0 }
  0x7f   : > { %1472 = vmatpush3.bf16.xpose.msra.mxu0 %v1031_v48 }
  0x80   : > { %1473 = vmatprep.subr.bf16.mxu0 %v1733_v0 }
  0x87   : > { %1474 = vmatpush3.bf16.xpose.msra.mxu0 %v1034_v50 }
  0x88   : > { %1475 = vmatprep.subr.bf16.mxu0 %v1733_v0 }
  0x8f   : > { %v472_v53 = vpop.permute.xlu0 %471  ;;  %1476 = vmatpush3.bf16.xpose.msra.mxu0 %v1037_v52 }
  0x90   : > { %v474_v54 = vsub.f32 %v1865_v1, %v472_v53  ;;  %1477 = vmatprep.subr.bf16.mxu0 %v1733_v0 }
  0x92   : > { %591 = vrot.lane.b32.xlu1 %v474_v54, %s1740_s23  ;;  %v515_v56 = vmul.f32 2.5, %v474_v54 }
  0x93   : > { %v467_v60 = vpop.permute.xlu0 %466 }
  0x94   : > { %v469_v61 = vadd.f32 %v467_v60, %v1865_v1 }
  0x96   : > { %517 = vrot.lane.b32.xlu1 %v515_v56, %s1736_s18  ;;  %v470_v2 = vmul.f32 0.5, %v469_v61  ;;  %s447_s18 = scalar_lea.vmem %s2140_s3, %s1350_s16  ;;  %s1342_s16 = sshll.u32 %s2016_s15, 3 }
  0x97   : > { %1478 = vmatpush3.bf16.xpose.msra.mxu0 %v1040_v57  ;;  %s410_s20 = scalar_lea.vmem [#allocation4], %s1342_s16 }
  0x98   : > { %s1155_s21 = sshll.u32 %s410_s20, 4  ;;  %s2045_s21 = int_to_ptr.vmem [resolvable:$true] %s1155_s21 }
  0x99   : > { %s1621_s23 = scalar_lea.vmem %s2045_s21, 128  ;;  %p1628_p1 = scmp.lt.s32.totalorder %s2045_s21, %s1626_s12 }
  0x9a   : > { %485 = vperm.xlu1 %1558, %v1865_v1   ;;  %p1622_p12 = scmp.ne.s32.totalorder %s2045_s21, %s1621_s23 }
  0x9c   : > { %p1623_p13 = pnand %p1622_p12, %p1828_p4 }
  0x9e   : > { %1559 = vset.pattern.permute.xlu1 %v1741_v59  ;;  %1480 = vmatmul.mubr.msk.bf16.vlgmr.msra.gmra.mrb[4].mxu0 %vm723_vm1, %v666_v58  ;;  %v1987_v58 = vld [vmem:[%s447_s18] sm:$0xff]  ;;  %p1624_p0 = pneg %p1623_p13  ;;  %s1627_s18 = scalar_lea.vmem %s1626_s12, 256 }
  0x9f   : > { %495 = vperm.xlu1 %1559, %v1865_v1   ;;  %v461_v60 = vrot.slane %v1987_v58, 2  ;;  %p1629_p2 = scmp.lt.s32.totalorder %s1627_s18, %s1621_s23 }
  0xa1   : > { %p1630_p3 = por %p1629_p2, %p1628_p1 }
  0xa3   : > { %1561 = vset.pattern.permute.xlu1 %v1737_v18  ;;  %p1631_p5 = pnand %p1630_p3, %p1624_p0 }
 0x104   : > { %v592_v62 = vpop.permute.xlu1 %591 }
 0x105   : > { %v594_v63 = vmul.f32 %v592_v62, %v474_v54  ;;  %v463_v62 = vadd.f32 %v461_v60, %v1987_v58 }
 0x107   : > { %601 = vperm.xlu1 %1561, %v594_v63  }
 0x108   : > { %v518_v3 = vpop.permute.xlu1 %517 }
 0x109   : > { %v520_v4 = vsub.f32 %v470_v2, %v518_v3  ;;  %v527_v5 = vadd.f32 %v518_v3, %v470_v2 }
 0x10b   : > { %1562 = vset.pattern.permute.xlu1 %v1738_v19  ;;  %530 = vperm.xlu0 %1563, %v527_v5  }
 0x10c   : > { %523 = vperm.xlu1 %1562, %v520_v4  }
 0x10f   : > { %1564 = vset.pattern.permute.xlu0 %v1742_v6 }
 0x110   : > { %1565 = vset.pattern.permute.xlu1 %v1741_v59  ;;  %626 = vperm.xlu0 %1564, %v1865_v1   ;;  %v475_v59 = vlaneseq }
 0x111   : > { %536 = vperm.xlu1 %1565, %v520_v4   ;;  %v481_v4 = vpop.permute.xlu0 %480 }
 0x112   : > { %v1990_v61 = vshrl.u32 %v475_v59, 7 }
 0x114   : > { %1568 = vset.pattern.permute.xlu0 %v1743_v7  ;;  %v477_v6 = vsub.s32 0, %v1990_v61  ;;  %v623_v60 = vsub.s32 4, %v1990_v61 }
 0x115   : > { %542 = vperm.xlu1 %1565, %v527_v5   ;;  %658 = vperm.xlu0 %1568, %v1865_v1   ;;  %v583_v5 = vrot.slane %v1987_v58, 6 }
 0x119   : > { %1566 = vset.pattern.permute.xlu1 %v1744_v8  ;;  %v486_v7 = vpop.permute.xlu1 %485 }
 0x11a   : > { %636 = vperm.xlu1 %1566, %v1865_v1  }
 0x11e   : > { %1567 = vset.pattern.permute.xlu1 %v1745_v9  ;;  %v570_v9 = vsub.s32 2, %v1990_v61 }
 0x11f   : > { %647 = vperm.xlu1 %1567, %v1865_v1  }
 0x131   : > { %v785_v10 = vpop.f32.mrb[0].mxu0 }
 0x132   : > { %v1364_v11 = vmul.f32 -1.442695, %v785_v10  ;;  %v930_v12 = vpop.f32.mrb[0].mxu1  ;;  %v1441_v13 = vpop.f32.mrb[1].mxu0  ;;  %v464_v10 = vmul.f32 0.5, %v463_v62 }
 0x133   : > { %v1374_v14 = vmul.f32 -1.442695, %v930_v12  ;;  %v788_v15 = vpop.f32.mrb[2].mxu0  ;;  %v1461_v16 = vpop.f32.mrb[1].mxu1  ;;  %v575_v12 = vsub.s32 3, %v1990_v61  ;;  %v492_v13 = vsub.s32 1, %v1990_v61 }
 0x134   : > { %1593 = vpow2.f32 %v1364_v11  ;;  %v1442_v17 = vpop.f32.mrb[3].mxu0  ;;  %v933_v18 = vpop.f32.mrb[2].mxu1  ;;  %v561_v15 = vrot.slane %v1987_v58, %v477_v6  ;;  %v478_v16 = vrot.slane %v464_v10, %v477_v6 }
 0x135   : > { %1595 = vpow2.f32 %v1374_v14  ;;  %v1462_v19 = vpop.f32.mrb[3].mxu1  ;;  %v585_v14 = vsub.f32 %v1987_v58, %v583_v5  ;;  %v571_v17 = vrot.slane %v1987_v58, %v570_v9  ;;  %v566_v18 = vrot.slane %v1987_v58, %v492_v13 }
 0x136   : > { %v576_v19 = vrot.slane %v1987_v58, %v575_v12  ;;  %vm488_vm2 = vcmp.lt.f32.partialorder %v478_v16, %v486_v7  ;;  %vm483_vm3 = vcmp.gt.f32.partialorder %v478_v16, %v481_v4  ;;  %v655_v5 = vsub.s32 7, %v1990_v61 }
 0x137   : > { %vm489_vm4 = vmand %vm483_vm3, %vm488_vm2 }
 0x13e   : > { %v1594_v20 = vpop.eup %1593 }
 0x13f   : > { %v1596_v21 = vpop.eup %1595  ;;  %v794_v22 = vadd.f32 1.0, %v1594_v20  ;;  %v562_v20 = vmax.f32 %v561_v15, %v481_v4 }
 0x140   : > { %v939_v23 = vadd.f32 1.0, %v1596_v21  ;;  %v496_v21 = vpop.permute.xlu1 %495 }
 0x141   : > { %1597 = vrcp.f32 %v794_v22  ;;  %v502_v22 = vpop.permute.xlu0 %501 }
 0x142   : > { %1599 = vrcp.f32 %v939_v23  ;;  %v572_v23 = vmin.f32 %v571_v17, %v486_v7 }
 0x14b   : > { %v1598_v24 = vpop.eup %1597 }
 0x14c   : > { %v1600_v1 = vpop.eup %1599  ;;  %v798_v25 = vsub.f32 1.0, %v1598_v24  ;;  %v807_v26 = vadd.f32 1e-08, %v1598_v24  ;;  %v797_v35 = vmul.f32 %v1598_v24, %v1598_v24  ;;  %v567_v24 = vmax.f32 %v566_v18, %v496_v21 }
 0x14d   : > { %v943_v27 = vsub.f32 1.0, %v1600_v1  ;;  %v952_v28 = vadd.f32 1e-08, %v1600_v1  ;;  %v942_v33 = vmul.f32 %v1600_v1, %v1600_v1  ;;  %v577_v1 = vmin.f32 %v576_v19, %v502_v22 }
 0x14e   : > { %v801_v29 = vadd.f32 1e-08, %v798_v25  ;;  %1601 = vlog2.f32 %v807_v26  ;;  %v799_v36 = vmul.f32 %v798_v25, %v798_v25  ;;  %v800_v47 = vmul.f32 0.75, %v797_v35 }
 0x14f   : > { %v946_v30 = vadd.f32 1e-08, %v943_v27  ;;  %1603 = vlog2.f32 %v952_v28  ;;  %v944_v31 = vmul.f32 %v943_v27, %v943_v27  ;;  %v945_v44 = vmul.f32 0.75, %v942_v33 }
 0x150   : > { %1605 = vlog2.f32 %v801_v29  ;;  %v806_v49 = vmul.f32 0.25, %v799_v36  ;;  %v587_v25 = vrot.slane %v585_v14, 1  ;;  %v493_v26 = vrot.slane %v464_v10, %v492_v13 }
 0x151   : > { %1607 = vlog2.f32 %v946_v30  ;;  %v951_v39 = vmul.f32 0.25, %v944_v31  ;;  %v578_v28 = vsub.f32 %v572_v23, %v562_v20  ;;  %v580_v29 = vsub.f32 %v577_v1, %v567_v24 }
 0x152   : > { %v589_v30 = vmul.f32 %v587_v25, %v585_v14  ;;  %vm498_vm5 = vcmp.gt.f32.partialorder %v493_v26, %v496_v21  ;;  %vm504_vm6 = vcmp.lt.f32.partialorder %v493_v26, %v502_v22  ;;  %v611_v35 = vmax.f32 %v571_v17, %v486_v7 }
 0x153   : > { %v581_v33 = vmax.f32 %v580_v29, 0.0  ;;  %vm499_vm7 = vmand %vm489_vm4, %vm498_vm5  ;;  %v609_v36 = vmin.f32 %v561_v15, %v481_v4  ;;  %v624_v4 = vrot.slane %v1987_v58, %v623_v60 }
 0x154   : > { %vm2003_vm8 = vmand %vm499_vm7, %vm504_vm6 }
 0x158   : > { %v1602_v32 = vpop.eup %1601 }
 0x159   : > { %v1604_v34 = vpop.eup %1603  ;;  %v809_v37 = vmul.f32 0.6931472, %v1602_v32  ;;  %v579_v32 = vmax.f32 %v578_v28, 0.0 }
 0x15a   : > { %v1606_v38 = vpop.eup %1605  ;;  %v954_v40 = vmul.f32 0.6931472, %v1604_v34  ;;  %v598_v34 = vrot.slane %v589_v30, %v570_v9 }
 0x15b   : > { %v1608_v41 = vpop.eup %1607  ;;  %v803_v42 = vmul.f32 0.6931472, %v1606_v38  ;;  %v810_v43 = vsub.f32 0.0, %v809_v37  ;;  %v610_v37 = vmin.f32 %v566_v18, %v496_v21  ;;  %v612_v38 = vmax.f32 %v576_v19, %v502_v22 }
 0x15c   : > { %v948_v45 = vmul.f32 0.6931472, %v1608_v41  ;;  %v955_v46 = vsub.f32 0.0, %v954_v40  ;;  %v582_v41 = vmul.f32 %v581_v33, %v579_v32 }
 0x15d   : > { %v804_v48 = vsub.f32 0.0, %v803_v42  ;;  %v811_v53 = vmul.f32 %v810_v43, %v806_v49  ;;  %v613_v43 = vsub.f32 %v611_v35, %v609_v36 }
 0x15e   : > { %v949_v50 = vsub.f32 0.0, %v948_v45  ;;  %v956_v51 = vmul.f32 %v955_v46, %v951_v39  ;;  %v1353_v46 = vsel %vm2003_vm8, 1.0, %v1733_v0 }
 0x15f   : > { %v805_v52 = vmul.f32 %v804_v48, %v800_v47 }
 0x160   : > { %v950_v54 = vmul.f32 %v949_v50, %v945_v44  ;;  %v614_v44 = vsub.f32 %v612_v38, %v610_v37  ;;  %v508_v50 = vrot.slane %v1353_v46, 4 }
 0x161   : > { %v812_v55 = vsub.f32 %v811_v53, %v805_v52 }
 0x162   : > { %v957_v56 = vsub.f32 %v956_v51, %v950_v54  ;;  %v2013_v51 = vmul.f32 %v614_v44, %v613_v43  ;;  %v509_v59 = vmax.f32 %v1353_v46, %v508_v50 }
 0x164   : > { %v1980_v57 = vadd.f32 %v957_v56, %v812_v55  ;;  %v617_v62 = vadd.f32 1e-09, %v2013_v51 }
 0x171   : > { %v1076_v63 = vpop.f32.mrb[4].mxu0 }
 0x172   : > { %v1384_v2 = vmul.f32 -1.442695, %v1076_v63  ;;  %v1481_v3 = vpop.f32.mrb[5].mxu0  ;;  %v633_v63 = vsub.s32 5, %v1990_v61 }
 0x173   : > { %v1079_v8 = vpop.f32.mrb[6].mxu0  ;;  %v510_v3 = vrot.slane %v509_v59, 2 }
 0x174   : > { %1609 = vpow2.f32 %v1384_v2  ;;  %v1482_v11 = vpop.f32.mrb[7].mxu0  ;;  %v634_v7 = vrot.slane %v1987_v58, %v633_v63 }
 0x175   : > { %v644_v11 = vsub.s32 6, %v1990_v61  ;;  %v511_v13 = vmax.f32 %v509_v59, %v510_v3  ;;  %v656_v61 = vrot.slane %v1987_v58, %v655_v5 }
 0x177   : > { %v645_v24 = vrot.slane %v1987_v58, %v644_v11 }
 0x17e   : > { %v1610_v27 = vpop.eup %1609 }
 0x17f   : > { %v1085_v31 = vadd.f32 1.0, %v1610_v27 }
 0x181   : > { %1611 = vrcp.f32 %v1085_v31 }
 0x186   : > { %v602_v39 = vpop.permute.xlu1 %601 }
 0x187   : > { %v604_v42 = vadd.f32 %v602_v39, %v598_v34 }
 0x189   : > { %v2007_v45 = vsub.f32 %v604_v42, %v582_v41 }
 0x18a   : > { %v531_v53 = vpop.permute.xlu0 %530 }
 0x18b   : > { %v606_v47 = vadd.f32 1e-09, %v2007_v45  ;;  %v524_v48 = vpop.permute.xlu1 %523  ;;  %v1612_v49 = vpop.eup %1611  ;;  %vm533_vm9 = vcmp.lt.f32.partialorder %v478_v16, %v531_v53 }
 0x18c   : > { %v1089_v52 = vsub.f32 1.0, %v1612_v49  ;;  %v1098_v54 = vadd.f32 1e-08, %v1612_v49  ;;  %vm526_vm10 = vcmp.gt.f32.partialorder %v478_v16, %v524_v48  ;;  %v1088_v21 = vmul.f32 %v1612_v49, %v1612_v49 }
 0x18d   : > { %1613 = vrcp.f32 %v606_v47  ;;  %vm534_vm12 = vmand %vm526_vm10, %vm533_vm9 }
 0x18e   : > { %v1092_v55 = vadd.f32 1e-08, %v1089_v52  ;;  %1615 = vlog2.f32 %v1098_v54  ;;  %v1090_v22 = vmul.f32 %v1089_v52, %v1089_v52 }
 0x18f   : > { %v627_v8 = vpop.permute.xlu0 %626 }
 0x190   : > { %v537_v56 = vpop.permute.xlu1 %536  ;;  %1617 = vlog2.f32 %v1092_v55  ;;  %v629_v16 = vsub.f32 %v624_v4, %v627_v8 }
 0x191   : > { %vm539_vm11 = vcmp.gt.f32.partialorder %v493_v26, %v537_v56  ;;  %1619 = vrcp.f32 %v617_v62 }
 0x192   : > { %vm540_vm13 = vmand %vm534_vm12, %vm539_vm11 }
 0x194   : > { %v543_v2 = vpop.permute.xlu1 %542  ;;  %v659_v20 = vpop.permute.xlu0 %658 }
 0x195   : > { %vm545_vm14 = vcmp.lt.f32.partialorder %v493_v26, %v543_v2 }
 0x196   : > { %vm2027_vm15 = vmand %vm540_vm13, %vm545_vm14 }
 0x197   : > { %v1614_v9 = vpop.eup %1613  ;;  %v1354_v10 = vsel %vm2027_vm15, 1.0, %v1733_v0 }
 0x198   : > { %v2036_v12 = vmul.f32 %v1614_v9, %v582_v41  ;;  %v549_v14 = vrot.slane %v1354_v10, 4  ;;  %v1616_v17 = vpop.eup %1615 }
 0x199   : > { %v637_v15 = vpop.permute.xlu1 %636  ;;  %v1100_v1 = vmul.f32 0.6931472, %v1616_v17 }
 0x19a   : > { %v550_v18 = vmax.f32 %v1354_v10, %v549_v14  ;;  %v639_v19 = vsub.f32 %v634_v7, %v637_v15  ;;  %1120 = vst [vmem:[%s410_s20] sm:$0xff] %v2036_v12  ;;  %v1618_v23 = vpop.eup %1617 }
 0x19b   : > { %1634 = shalt.err (!%p1631_p5)
}
 0x19c   : > { %s1635_s20 = scalar_lea.hbm %s2043_s30, 128  ;;  %s1639_s10 = scalar_lea.hbm %s2144_s7, 256 }
 0x19d   : > { %p1636_p6 = scmp.ne.s32.totalorder %s2043_s30, %s1635_s20  ;;  %p1640_p10 = scmp.lt.u32.totalorder %s2043_s30, %s2144_s7 }
 0x19e   : > { %p1641_p11 = scmp.lt.u32.totalorder %s1639_s10, %s1635_s20  ;;  %p1643_p13 = scmp.lt.u32.totalorder %s1635_s20, %s2043_s30 }
 0x19f   : > { %p1637_p7 = pnand %p1636_p6, %p1828_p4 }
 0x1a0   : > { %p1642_p12 = por %p1641_p11, %p1640_p10 }
 0x1a1   : > { %p1638_p9 = pneg %p1637_p7 }
 0x1a2   : > { %p1644_p0 = por %p1643_p13, %p1642_p12 }
 0x1a4   : > { %p1645_p1 = pnand %p1644_p0, %p1638_p9 }
 0x1a6   : > { %1648 = shalt.err (!%p1645_p1)
}
 0x1a7   : > { %1485 = dma.vmem_to_hbm [thread:$0]  (%p1828_p4), %s2045_s21, 128, %s2043_s30, %s1127_s8   ;;  %v616_v58 = vsub.f32 %v2013_v51, %v2007_v45  ;;  %v512_v25 = vrot.slane %v511_v13, 1  ;;  %v551_v26 = vrot.slane %v550_v18, 2  ;;  %v1094_v27 = vmul.f32 0.6931472, %v1618_v23  ;;  %v648_v33 = vpop.permute.xlu1 %647  ;;  %v1620_v37 = vpop.eup %1619  ;;  %vm557_vm0 = vmand %vm2003_vm8, %vm2027_vm15 }
 0x1a8   : > { %v640_v28 = vand.u32 2147483647, %v639_v19  ;;  %v630_v29 = vand.u32 2147483647, %v629_v16  ;;  %v661_v30 = vsub.f32 %v656_v61, %v659_v20  ;;  %v1101_v31 = vsub.f32 0.0, %v1100_v1  ;;  %s403_s19 = scalar_lea.vmem [#allocation2], %s1342_s16 }
 0x1a9   : > { %v552_v32 = vmax.f32 %v550_v18, %v551_v26  ;;  %v1091_v34 = vmul.f32 0.75, %v1088_v21  ;;  %v1095_v35 = vsub.f32 0.0, %v1094_v27  ;;  %v1097_v36 = vmul.f32 0.25, %v1090_v22  ;;  %s1141_s21 = sshll.u32 %s403_s19, 4  ;;  %s2152_s30 = sshll.u32 %s1723_s27, 7  ;;  %s2091_s21 = int_to_ptr.vmem [resolvable:$true] %s1141_s21 }
 0x1aa   : > { %v650_v38 = vsub.f32 %v645_v24, %v648_v33  ;;  %v513_v39 = vmax.f32 %v511_v13, %v512_v25  ;;  %v641_v44 = vadd.f32 %v640_v28, %v630_v29  ;;  %v662_v46 = vand.u32 2147483647, %v661_v30  ;;  %s2089_s18 = scalar_lea.hbm %s2143_s6, %s2152_s30  ;;  %s1122_s20 = scalar_lea.sflag [#allocation3], %s2016_s15 }
 0x1ab   : > { %v553_v41 = vrot.slane %v552_v32, 1  ;;  %v1096_v42 = vmul.f32 %v1095_v35, %v1091_v34  ;;  %v1102_v43 = vmul.f32 %v1101_v31, %v1097_v36  ;;  %v619_v47 = vmul.f32 %v1620_v37, %v616_v58  ;;  %s1649_s17 = scalar_lea.vmem %s2091_s21, 128  ;;  %s1747_s16 = smov [#allocation2]  }
 0x1ac   : > { %v651_v45 = vand.u32 2147483647, %v650_v38  ;;  %v1385_v50 = vsel %vm557_vm0, 1.0, %v1733_v0  ;;  %vm514_vm1 = vcmp.gt.f32.partialorder %v513_v39, 0.0  ;;  %p1650_p2 = scmp.ne.s32.totalorder %s2091_s21, %s1649_s17  ;;  %s1653_s22 = sshll.u32 %s1747_s16, 4  ;;  %s1654_s22 = int_to_ptr.vmem [resolvable:$false] %s1653_s22 }
 0x1ad   : > { %v554_v48 = vmax.f32 %v552_v32, %v553_v41  ;;  %v1103_v49 = vsub.f32 %v1102_v43, %v1096_v42  ;;  %v620_v52 = vsub.f32 %v2036_v12, %v619_v47  ;;  %v1108_v54 = vsub.f32 1.0, %v1385_v50  ;;  %s1655_s27 = scalar_lea.vmem %s1654_s22, 256  ;;  %p1656_p6 = scmp.lt.s32.totalorder %s2091_s21, %s1654_s22 }
 0x1ae   : > { %v652_v51 = vadd.f32 %v651_v45, %v641_v44  ;;  %p1651_p3 = pnand %p1650_p2, %p1828_p4  ;;  %p1657_p7 = scmp.lt.s32.totalorder %s1655_s27, %s1649_s17 }
 0x1af   : > { %vm555_vm2 = vcmp.gt.f32.partialorder %v554_v48, 0.0  ;;  %v1104_v53 = vadd.f32 %v1103_v49, %v1980_v57  ;;  %v1113_v60 = vsub.f32 0.0, %v620_v52  ;;  %v1115_v63 = vmul.f32 100.0, %v1108_v54 }
 0x1b0   : > { %vm556_vm3 = vmor %vm514_vm1, %vm555_vm2  ;;  %v663_v40 = vadd.f32 %v662_v46, %v652_v51  ;;  %p1652_p5 = pneg %p1651_p3  ;;  %p1658_p9 = por %p1657_p7, %p1656_p6 }
 0x1b1   : > { %v1105_v55 = vmul.f32 0.33333334, %v1104_v53  ;;  %v1386_v56 = vsel %vm556_vm3, 1.0, %v1733_v0 }
 0x1b2   : > { %v1111_v62 = vsub.f32 1.0, %v1386_v56  ;;  %p1659_p10 = pnand %p1658_p9, %p1652_p5 }
 0x1b3   : > { %v1112_v59 = vadd.f32 %v1105_v55, %v663_v40 }
 0x1b4   : > { %v1117_v4 = vmul.f32 10000.0, %v1111_v62 }
 0x1b5   : > { %v1114_v2 = vadd.f32 %v1113_v60, %v1112_v59 }
 0x1b7   : > { %v1116_v3 = vadd.f32 %v1115_v63, %v1114_v2 }
 0x1b9   : > { %v1118_v57 = vadd.f32 %v1117_v4, %v1116_v3 }
 0x1bb   : > { %1119 = vst [vmem:[%s403_s19] sm:$0xff] %v1118_v57 }
 0x1bc   : > { %1662 = shalt.err (!%p1659_p10)
}
 0x1bd   : > { %s1663_s15 = scalar_lea.hbm %s2089_s18, 128  ;;  %s1667_s19 = scalar_lea.hbm %s2143_s6, 256 }
 0x1be   : > { %p1664_p11 = scmp.ne.s32.totalorder %s2089_s18, %s1663_s15  ;;  %p1668_p0 = scmp.lt.u32.totalorder %s2089_s18, %s2143_s6 }
 0x1bf   : > { %p1669_p1 = scmp.lt.u32.totalorder %s1667_s19, %s1663_s15  ;;  %p1671_p3 = scmp.lt.u32.totalorder %s1663_s15, %s2089_s18 }
 0x1c0   : > { %p1665_p12 = pnand %p1664_p11, %p1828_p4 }
 0x1c1   : > { %p1670_p2 = por %p1669_p1, %p1668_p0 }
 0x1c2   : > { %p1666_p13 = pneg %p1665_p12 }
 0x1c3   : > { %p1672_p5 = por %p1671_p3, %p1670_p2 }
 0x1c5   : > { %p1673_p6 = pnand %p1672_p5, %p1666_p13 }
 0x1c7   : > { %1676 = shalt.err (!%p1673_p6)
}
 0x1c8   : > { %1484 = dma.vmem_to_hbm [thread:$0]  (%p1828_p4), %s2091_s21, 128, %s2089_s18, %s1122_s20  }
 0x1c9 PF: > { %p1495_p7 = scmp.ge.s32.totalorder %s1731_s29, 2  ;;  %s1167_s23 = sand.u32 1, %s1711_s24  }
 0x1ca   : > { %s1168_s17 = scalar_lea.sflag [#allocation3], %s1167_s23 }
 0x1cb   : > { %p1489_p9 = pnand %p1495_p7, %p1835_p8 }
 0x1cd   : > { %1702 = dma.done.wait (!%p1489_p9), %s1168_s17, 128  }
 0x1ce   : > { %1704 = vsyncadd (!%p1489_p9), %s1168_s17, 4294967168  ;;  %s1177_s16 = scalar_lea.sflag [#allocation5], %s1167_s23 }
 0x1cf   : > { %1706 = dma.done.wait (!%p1489_p9), %s1177_s16, 128  }
 0x1d0   : > { %1708 = vsyncadd (!%p1489_p9), %s1177_s16, 4294967168  ;;  %s24_s29 = sadd.s32 1, %s1731_s29   ;;  %s2153_s24 = smov %s1715_s25 }
 0x1d1   : > { %p21_p10 = scmp.ge.s32.totalorder %s24_s29, 4   ;;  %s2154_s25 = smov %s1719_s26 }
 0x1d2   : > { %s2155_s26 = smov %s1841_s14  ;;  %s2156_s27 = smov %s1727_s28 }
 0x1d3   : > { %s2157_s28 = smov %s2159_s9  ;;  %23 = sbr.rel (!%p21_p10) target bundleno = 6 (0x6), region = 111 }
 0x1da   :  { %1182 = vsyncpa [#allocation3], 1 }
 0x1db   :  { %1184 = vsyncpa [#allocation3 + $0x1], 1 }
 0x1dc   :  { %1185 = vsyncpa [#allocation5], 1 }
 0x1dd   :  { %1187 = vsyncpa [#allocation5 + $0x1], 1 }

</bundles_post_ra>
